<compile_context>
chip_gen: v6e
topology: v6e:2x2x1
jax: 0.10.0
libtpu: 0.0.40
codegen_flags: <defaults>
</compile_context>

<pallas_src>
import functools

import numpy as np
import jax
import jax.numpy as jnp
from jax.experimental import pallas as pl
from jax.experimental.pallas import tpu as pltpu

# ----- hyper-params implied by Caser.__init__ -----
HIDDEN_SIZE = 32          # embedding dim
ITEM_NUM = 64             # number of items (padding id == ITEM_NUM)
STATE_SIZE = 8            # sequence length L
NUM_FILTERS = 4
FILTER_SIZES = (2, 3, 4)  # eval(filter_sizes)
NUM_FILTERS_TOTAL = NUM_FILTERS * len(FILTER_SIZES)
FINAL_DIM = HIDDEN_SIZE + NUM_FILTERS_TOTAL

# ----- kernel layout constants -----
VOCAB_PACK = 64           # one packed time step occupies 64 lanes (items 0..63)
PAIRS = STATE_SIZE // 2   # two time steps per 128-lane one-hot
SLOT_W = 16               # lanes per time slot in the feature block
FEAT_COLS = 128           # 8 slots x (12 horiz + 4 vert) = 128 lanes, fully used
OUT_PAD = 128             # ITEM_NUM padded to a lane-dense output width


def caser_kernel(states_ref, wfeat_ref, bfeat_ref, wfc_ref, bfc_ref, out_ref):
    states = states_ref[...]                                     # (TB, L) int32
    tb = states.shape[0]
    lane = jax.lax.broadcasted_iota(jnp.int32, (tb, 128), 1)

    # Feature extraction: gather + horizontal convs + vertical conv are linear
    # in the one-hot item ids; two time steps share one lane-dense (TB,128)
    # one-hot (even step -> lanes [0,64), odd step -> lanes [64,128)), so the
    # whole thing is 4 accumulated K=128 MXU matmuls.  Padding id 64 matches no
    # lane, which folds the torch `mask` into the gather for free.
    acc = None
    for p in range(PAIRS):                                       # static unroll, 4 pairs
        tgt = jnp.where(lane < VOCAB_PACK,
                        states[:, 2 * p:2 * p + 1],
                        states[:, 2 * p + 1:2 * p + 2] + VOCAB_PACK)
        onehot = (lane == tgt).astype(jnp.float32)               # (TB, 128)
        contrib = jnp.dot(onehot, wfeat_ref[p],
                          preferred_element_type=jnp.float32)    # (TB, 128)
        acc = contrib if acc is None else acc + contrib
    feat = jnp.maximum(acc + bfeat_ref[...], 0.0)                # relu (bias added once)

    # Time max-pool over the 8 slots via cyclic lane rolls (XLU) + VPU max:
    # afterwards lane c holds max over lanes congruent to c (mod 16).  Padded
    # (zero-weight, zero-bias) horizontal slots contribute relu(0)=0 -> safe.
    m = jnp.maximum(feat, pltpu.roll(feat, shift=64, axis=1))
    m = jnp.maximum(m, pltpu.roll(m, shift=32, axis=1))
    m = jnp.maximum(m, pltpu.roll(m, shift=16, axis=1))

    # Lanes with residue >= 12 carry the vertical conv (no pooling); merge them
    # with the pooled horizontal lanes so the final Linear is ONE fc matmul.
    is_vert = (lane % SLOT_W) >= NUM_FILTERS_TOTAL
    combined = jnp.where(is_vert, feat, m)                       # (TB, 128)

    # TODO(synk): dropout treated as identity (eval mode); training-mode dropout
    # would need pltpu.prng_seed / prng_random_bits masking before this matmul.
    out_ref[...] = bfc_ref[...] + jnp.dot(combined, wfc_ref[...],
                                          preferred_element_type=jnp.float32)


def _round_up(x, m):
    return (x + m - 1) // m * m


@functools.partial(jax.jit, static_argnames=("tb",))
def caser_forward(states, kparams, tb=1024):
    """states: (B, L) int32 item ids (padding id == ITEM_NUM)."""
    B, L = states.shape
    TB = min(tb, max(8, _round_up(B, 8)))
    Bp = _round_up(B, TB)
    if Bp != B:
        pad = jnp.full((Bp - B, L), ITEM_NUM, dtype=states.dtype)
        states = jnp.concatenate([states, pad], axis=0)

    out = pl.pallas_call(
        caser_kernel,
        out_shape=jax.ShapeDtypeStruct((Bp, OUT_PAD), jnp.float32),
        grid_spec=pltpu.PrefetchScalarGridSpec(
            num_scalar_prefetch=0,
            grid=(Bp // TB,),
            in_specs=[
                pl.BlockSpec((TB, L), lambda i: (i, 0)),                    # states tile
                pl.BlockSpec((PAIRS, 2 * VOCAB_PACK, FEAT_COLS),
                             lambda i: (0, 0, 0)),                          # w_feat (resident)
                pl.BlockSpec((1, FEAT_COLS), lambda i: (0, 0)),             # b_feat
                pl.BlockSpec((FEAT_COLS, OUT_PAD), lambda i: (0, 0)),       # wfc (combined)
                pl.BlockSpec((1, OUT_PAD), lambda i: (0, 0)),               # b_fc
            ],
            out_specs=pl.BlockSpec((TB, OUT_PAD), lambda i: (i, 0)),
        ),
        compiler_params=pltpu.CompilerParams(
            dimension_semantics=("parallel",),
            vmem_limit_bytes=32 * 1024 * 1024,
        ),
    )(states, kparams['w_feat'], kparams['b_feat'], kparams['wfc'], kparams['b_fc'])
    return out[:B, :ITEM_NUM]


def prepare_kernel_params(emb_table, params):
    """Fold embedding table, conv weights and the final fc into the lane-dense
    matrices consumed by the kernel (host-side, done once at init)."""
    H, L, NF = HIDDEN_SIZE, STATE_SIZE, NUM_FILTERS

    table = np.asarray(emb_table[:ITEM_NUM], np.float32)       # (64, H); padding row dropped

    # M[t, h, col] = d(pre_activation_feature[col]) / d(emb[t, h])
    M = np.zeros((L, H, FEAT_COLS), np.float32)
    b_feat = np.zeros((1, FEAT_COLS), np.float32)
    # Horizontal convs: col = slot*16 + group*4 + filter, valid slots only.
    for g, fs in enumerate(FILTER_SIZES):
        Wh = np.asarray(params[f'wh{fs}'], np.float32)          # (fs, H, NF)
        bh = np.asarray(params[f'bh{fs}'], np.float32).reshape(NF)
        for tt in range(L - fs + 1):
            for f in range(NF):
                col = tt * SLOT_W + g * NF + f
                b_feat[0, col] = bh[f]
                for r in range(fs):
                    M[tt + r, :, col] += Wh[r, :, f]
    # Vertical conv: dim h lives at col = (h//4)*16 + 12 + (h%4).
    wv = np.asarray(params['wv'], np.float32).reshape(L)
    bv = float(np.asarray(params['bv']).reshape(()))
    for h in range(H):
        col = (h // 4) * SLOT_W + NUM_FILTERS_TOTAL + (h % 4)
        M[:, h, col] = wv
        b_feat[0, col] = bv

    # Fold the embedding table and pack two consecutive time steps per matrix.
    w_feat = np.zeros((PAIRS, 2 * VOCAB_PACK, FEAT_COLS), np.float32)   # (4,128,128)
    for p in range(PAIRS):
        w_feat[p, :ITEM_NUM] = table @ M[2 * p]                 # even step -> rows [0,64)
        w_feat[p, ITEM_NUM:2 * ITEM_NUM] = table @ M[2 * p + 1]  # odd step -> rows [64,128)

    # Final fc, re-indexed onto the combined (pooled-horizontal + vertical) lanes.
    wfc = np.asarray(params['wfc'], np.float32)                 # (FINAL_DIM, ITEM_NUM)
    bfc = np.asarray(params['bfc'], np.float32).reshape(ITEM_NUM)
    wfc_comb = np.zeros((FEAT_COLS, OUT_PAD), np.float32)
    wfc_comb[:NUM_FILTERS_TOTAL, :ITEM_NUM] = wfc[:NUM_FILTERS_TOTAL]   # pooled maxes (slot 0 only)
    for h in range(H):
        row = (h // 4) * SLOT_W + NUM_FILTERS_TOTAL + (h % 4)
        wfc_comb[row, :ITEM_NUM] = wfc[NUM_FILTERS_TOTAL + h]
    b_fc = np.zeros((1, OUT_PAD), np.float32)
    b_fc[0, :ITEM_NUM] = bfc

    return dict(w_feat=jnp.asarray(w_feat), b_feat=jnp.asarray(b_feat),
                wfc=jnp.asarray(wfc_comb), b_fc=jnp.asarray(b_fc))


def init_params(key):
    """Parameters matching the PyTorch module's initializers."""
    ks = jax.random.split(key, 8)
    params = {}
    emb_table = 0.01 * jax.random.normal(ks[0], (ITEM_NUM + 1, HIDDEN_SIZE), jnp.float32)
    for i, fs in enumerate(FILTER_SIZES):
        fan_in = 1 * fs * HIDDEN_SIZE
        fan_out = NUM_FILTERS * fs * HIDDEN_SIZE
        std = (2.0 / (fan_in + fan_out)) ** 0.5
        w = std * jax.random.normal(ks[1 + i], (NUM_FILTERS, fs, HIDDEN_SIZE), jnp.float32)
        params[f'wh{fs}'] = jnp.transpose(w, (1, 2, 0))         # (fs, H, NF)
        params[f'bh{fs}'] = jnp.full((1, NUM_FILTERS), 0.1, jnp.float32)
    std_v = (2.0 / (STATE_SIZE + STATE_SIZE)) ** 0.5
    params['wv'] = std_v * jax.random.normal(ks[4], (STATE_SIZE, 1), jnp.float32)
    params['bv'] = jnp.full((1, 1), 0.1, jnp.float32)
    bound = 1.0 / (FINAL_DIM ** 0.5)
    params['wfc'] = jax.random.uniform(ks[5], (FINAL_DIM, ITEM_NUM), jnp.float32, -bound, bound)
    params['bfc'] = jax.random.uniform(ks[6], (1, ITEM_NUM), jnp.float32, -bound, bound)
    return emb_table, params


def caser_reference(states, emb_table, params):
    """Pure-JAX reference mirroring the PyTorch forward (eval-mode dropout)."""
    mask = (states != ITEM_NUM).astype(jnp.float32)[..., None]
    emb = emb_table[states] * mask                              # (B, L, H)
    pooled = []
    for fs in FILTER_SIZES:
        W = params[f'wh{fs}']                                   # (fs, H, NF)
        b = params[f'bh{fs}']                                   # (1, NF)
        outs = []
        for tt in range(STATE_SIZE - fs + 1):
            s = b + sum(emb[:, tt + r, :] @ W[r] for r in range(fs))
            outs.append(s)
        hcat = jnp.stack(outs, axis=1)                          # (B, T, NF)
        pooled.append(jnp.max(jax.nn.relu(hcat), axis=1))       # (B, NF)
    h_pool = jnp.concatenate(pooled, axis=1)                    # (B, 12)
    v = jax.nn.relu(jnp.sum(emb * params['wv'][None, :, :], axis=1)
                    + params['bv'][0, 0])                       # (B, H)
    out = jnp.concatenate([h_pool, v], axis=1)                  # (B, FINAL_DIM)
    return out @ params['wfc'] + params['bfc']


if __name__ == "__main__":
    key = jax.random.PRNGKey(0)
    k_param, k_s1, k_s2 = jax.random.split(key, 3)
    emb_table, params = init_params(k_param)
    kparams = prepare_kernel_params(emb_table, params)

    # small demo batch; ids in [0, ITEM_NUM], value ITEM_NUM is the padding id
    states = jax.random.randint(k_s1, (2, STATE_SIZE), 0, ITEM_NUM + 1, dtype=jnp.int32)
    logits = jax.block_until_ready(caser_forward(states, kparams))
    ref = caser_reference(states, emb_table, params)
    assert logits.shape == (2, ITEM_NUM)
    assert jnp.allclose(logits, ref, atol=2e-3, rtol=2e-3), "mismatch vs reference (B=2)"

    # second check exercising a multi-step, padded batch grid (grid = 3 tiles)
    states2 = jax.random.randint(k_s2, (20, STATE_SIZE), 0, ITEM_NUM + 1, dtype=jnp.int32)
    logits2 = jax.block_until_ready(caser_forward(states2, kparams, tb=8))
    ref2 = caser_reference(states2, emb_table, params)
    assert logits2.shape == (20, ITEM_NUM)
    assert jnp.allclose(logits2, ref2, atol=2e-3, rtol=2e-3), "mismatch vs reference (B=20)"

    print("KERNEL_OK")
</pallas_src>

<mosaic_0001>
module attributes {stable_mosaic.version = 11 : i64} {
  func.func @caser_kernel(%arg0: i32, %arg1: memref<8x8xi32, #tpu.memory_space<vmem>>, %arg2: memref<4x128x128xf32, #tpu.memory_space<vmem>>, %arg3: memref<1x128xf32, #tpu.memory_space<vmem>>, %arg4: memref<128x128xf32, #tpu.memory_space<vmem>>, %arg5: memref<1x128xf32, #tpu.memory_space<vmem>>, %arg6: memref<8x128xf32, #tpu.memory_space<vmem>>) attributes {dimension_semantics = [#tpu.dimension_semantics<parallel>], iteration_bounds = array<i64: 1>, scalar_prefetch = 0 : i64, scratch_operands = 0 : i64, tpu.core_type = #tpu.core_type<tc>, window_params = [{transform_indices = @transform_0, window_bounds = array<i64: 8, 8>}, {pipeline_mode = #tpu.pipeline_mode<synchronous>, transform_indices = @transform_1, window_bounds = array<i64: 4, 128, 128>}, {pipeline_mode = #tpu.pipeline_mode<synchronous>, transform_indices = @transform_2, window_bounds = array<i64: 1, 128>}, {pipeline_mode = #tpu.pipeline_mode<synchronous>, transform_indices = @transform_3, window_bounds = array<i64: 128, 128>}, {pipeline_mode = #tpu.pipeline_mode<synchronous>, transform_indices = @transform_4, window_bounds = array<i64: 1, 128>}, {transform_indices = @transform_5, window_bounds = array<i64: 8, 128>}]} {
    %c0 = arith.constant 0 : index
    %c0_0 = arith.constant 0 : index
    %0 = vector.load %arg1[%c0, %c0_0] : memref<8x8xi32, #tpu.memory_space<vmem>>, vector<8x8xi32>
    %1 = tpu.iota {dimensions = array<i32: 1>} : vector<8x128xi32>
    %c64_i32 = arith.constant 64 : i32
    %2 = vector.broadcast %c64_i32 : i32 to vector<8x128xi32>
    %3 = arith.cmpi slt, %1, %2 : vector<8x128xi32>
    %4 = vector.extract_strided_slice %0 {offsets = [0, 0], sizes = [8, 1], strides = [1, 1]} : vector<8x8xi32> to vector<8x1xi32>
    %5 = vector.extract_strided_slice %0 {offsets = [0, 1], sizes = [8, 1], strides = [1, 1]} : vector<8x8xi32> to vector<8x1xi32>
    %c64_i32_1 = arith.constant 64 : i32
    %6 = vector.broadcast %c64_i32_1 : i32 to vector<8x1xi32>
    %7 = arith.addi %5, %6 : vector<8x1xi32>
    %8 = vector.shape_cast %4 : vector<8x1xi32> to vector<8x1xi32>
    %9 = vector.broadcast %8 : vector<8x1xi32> to vector<8x128xi32>
    %10 = vector.shape_cast %7 : vector<8x1xi32> to vector<8x1xi32>
    %11 = vector.broadcast %10 : vector<8x1xi32> to vector<8x128xi32>
    %12 = arith.select %3, %9, %11 : vector<8x128xi1>, vector<8x128xi32>
    %13 = arith.cmpi eq, %1, %12 : vector<8x128xi32>
    %14 = arith.extui %13 : vector<8x128xi1> to vector<8x128xi32>
    %15 = arith.sitofp %14 : vector<8x128xi32> to vector<8x128xf32>
    %c0_2 = arith.constant 0 : index
    %c0_3 = arith.constant 0 : index
    %c0_4 = arith.constant 0 : index
    %16 = vector.load %arg2[%c0_2, %c0_3, %c0_4] : memref<4x128x128xf32, #tpu.memory_space<vmem>>, vector<1x128x128xf32>
    %17 = vector.shape_cast %16 : vector<1x128x128xf32> to vector<128x128xf32>
    %cst = arith.constant dense<0.000000e+00> : vector<8x128xf32>
    %18 = tpu.matmul %15, %17, %cst {dimension_numbers = #tpu.dot_dimension_numbers<[1], [0], [0], [1], [0, 0, 1, 1], [], []>} : vector<8x128xf32>, vector<128x128xf32>, vector<8x128xf32> -> vector<8x128xf32>
    %c64_i32_5 = arith.constant 64 : i32
    %19 = vector.broadcast %c64_i32_5 : i32 to vector<8x128xi32>
    %20 = arith.cmpi slt, %1, %19 : vector<8x128xi32>
    %21 = vector.extract_strided_slice %0 {offsets = [0, 2], sizes = [8, 1], strides = [1, 1]} : vector<8x8xi32> to vector<8x1xi32>
    %22 = vector.extract_strided_slice %0 {offsets = [0, 3], sizes = [8, 1], strides = [1, 1]} : vector<8x8xi32> to vector<8x1xi32>
    %c64_i32_6 = arith.constant 64 : i32
    %23 = vector.broadcast %c64_i32_6 : i32 to vector<8x1xi32>
    %24 = arith.addi %22, %23 : vector<8x1xi32>
    %25 = vector.shape_cast %21 : vector<8x1xi32> to vector<8x1xi32>
    %26 = vector.broadcast %25 : vector<8x1xi32> to vector<8x128xi32>
    %27 = vector.shape_cast %24 : vector<8x1xi32> to vector<8x1xi32>
    %28 = vector.broadcast %27 : vector<8x1xi32> to vector<8x128xi32>
    %29 = arith.select %20, %26, %28 : vector<8x128xi1>, vector<8x128xi32>
    %30 = arith.cmpi eq, %1, %29 : vector<8x128xi32>
    %31 = arith.extui %30 : vector<8x128xi1> to vector<8x128xi32>
    %32 = arith.sitofp %31 : vector<8x128xi32> to vector<8x128xf32>
    %c1 = arith.constant 1 : index
    %c0_7 = arith.constant 0 : index
    %c0_8 = arith.constant 0 : index
    %33 = vector.load %arg2[%c1, %c0_7, %c0_8] : memref<4x128x128xf32, #tpu.memory_space<vmem>>, vector<1x128x128xf32>
    %34 = vector.shape_cast %33 : vector<1x128x128xf32> to vector<128x128xf32>
    %cst_9 = arith.constant dense<0.000000e+00> : vector<8x128xf32>
    %35 = tpu.matmul %32, %34, %cst_9 {dimension_numbers = #tpu.dot_dimension_numbers<[1], [0], [0], [1], [0, 0, 1, 1], [], []>} : vector<8x128xf32>, vector<128x128xf32>, vector<8x128xf32> -> vector<8x128xf32>
    %36 = arith.addf %18, %35 : vector<8x128xf32>
    %c64_i32_10 = arith.constant 64 : i32
    %37 = vector.broadcast %c64_i32_10 : i32 to vector<8x128xi32>
    %38 = arith.cmpi slt, %1, %37 : vector<8x128xi32>
    %39 = vector.extract_strided_slice %0 {offsets = [0, 4], sizes = [8, 1], strides = [1, 1]} : vector<8x8xi32> to vector<8x1xi32>
    %40 = vector.extract_strided_slice %0 {offsets = [0, 5], sizes = [8, 1], strides = [1, 1]} : vector<8x8xi32> to vector<8x1xi32>
    %c64_i32_11 = arith.constant 64 : i32
    %41 = vector.broadcast %c64_i32_11 : i32 to vector<8x1xi32>
    %42 = arith.addi %40, %41 : vector<8x1xi32>
    %43 = vector.shape_cast %39 : vector<8x1xi32> to vector<8x1xi32>
    %44 = vector.broadcast %43 : vector<8x1xi32> to vector<8x128xi32>
    %45 = vector.shape_cast %42 : vector<8x1xi32> to vector<8x1xi32>
    %46 = vector.broadcast %45 : vector<8x1xi32> to vector<8x128xi32>
    %47 = arith.select %38, %44, %46 : vector<8x128xi1>, vector<8x128xi32>
    %48 = arith.cmpi eq, %1, %47 : vector<8x128xi32>
    %49 = arith.extui %48 : vector<8x128xi1> to vector<8x128xi32>
    %50 = arith.sitofp %49 : vector<8x128xi32> to vector<8x128xf32>
    %c2 = arith.constant 2 : index
    %c0_12 = arith.constant 0 : index
    %c0_13 = arith.constant 0 : index
    %51 = vector.load %arg2[%c2, %c0_12, %c0_13] : memref<4x128x128xf32, #tpu.memory_space<vmem>>, vector<1x128x128xf32>
    %52 = vector.shape_cast %51 : vector<1x128x128xf32> to vector<128x128xf32>
    %cst_14 = arith.constant dense<0.000000e+00> : vector<8x128xf32>
    %53 = tpu.matmul %50, %52, %cst_14 {dimension_numbers = #tpu.dot_dimension_numbers<[1], [0], [0], [1], [0, 0, 1, 1], [], []>} : vector<8x128xf32>, vector<128x128xf32>, vector<8x128xf32> -> vector<8x128xf32>
    %54 = arith.addf %36, %53 : vector<8x128xf32>
    %c64_i32_15 = arith.constant 64 : i32
    %55 = vector.broadcast %c64_i32_15 : i32 to vector<8x128xi32>
    %56 = arith.cmpi slt, %1, %55 : vector<8x128xi32>
    %57 = vector.extract_strided_slice %0 {offsets = [0, 6], sizes = [8, 1], strides = [1, 1]} : vector<8x8xi32> to vector<8x1xi32>
    %58 = vector.extract_strided_slice %0 {offsets = [0, 7], sizes = [8, 1], strides = [1, 1]} : vector<8x8xi32> to vector<8x1xi32>
    %c64_i32_16 = arith.constant 64 : i32
    %59 = vector.broadcast %c64_i32_16 : i32 to vector<8x1xi32>
    %60 = arith.addi %58, %59 : vector<8x1xi32>
    %61 = vector.shape_cast %57 : vector<8x1xi32> to vector<8x1xi32>
    %62 = vector.broadcast %61 : vector<8x1xi32> to vector<8x128xi32>
    %63 = vector.shape_cast %60 : vector<8x1xi32> to vector<8x1xi32>
    %64 = vector.broadcast %63 : vector<8x1xi32> to vector<8x128xi32>
    %65 = arith.select %56, %62, %64 : vector<8x128xi1>, vector<8x128xi32>
    %66 = arith.cmpi eq, %1, %65 : vector<8x128xi32>
    %67 = arith.extui %66 : vector<8x128xi1> to vector<8x128xi32>
    %68 = arith.sitofp %67 : vector<8x128xi32> to vector<8x128xf32>
    %c3 = arith.constant 3 : index
    %c0_17 = arith.constant 0 : index
    %c0_18 = arith.constant 0 : index
    %69 = vector.load %arg2[%c3, %c0_17, %c0_18] : memref<4x128x128xf32, #tpu.memory_space<vmem>>, vector<1x128x128xf32>
    %70 = vector.shape_cast %69 : vector<1x128x128xf32> to vector<128x128xf32>
    %cst_19 = arith.constant dense<0.000000e+00> : vector<8x128xf32>
    %71 = tpu.matmul %68, %70, %cst_19 {dimension_numbers = #tpu.dot_dimension_numbers<[1], [0], [0], [1], [0, 0, 1, 1], [], []>} : vector<8x128xf32>, vector<128x128xf32>, vector<8x128xf32> -> vector<8x128xf32>
    %72 = arith.addf %54, %71 : vector<8x128xf32>
    %c0_20 = arith.constant 0 : index
    %c0_21 = arith.constant 0 : index
    %73 = vector.load %arg3[%c0_20, %c0_21] : memref<1x128xf32, #tpu.memory_space<vmem>>, vector<1x128xf32>
    %74 = vector.broadcast %73 : vector<1x128xf32> to vector<8x128xf32>
    %75 = arith.addf %72, %74 : vector<8x128xf32>
    %cst_22 = arith.constant 0.000000e+00 : f32
    %76 = vector.broadcast %cst_22 : f32 to vector<8x128xf32>
    %77 = arith.maximumf %75, %76 : vector<8x128xf32>
    %c64_i32_23 = arith.constant 64 : i32
    %78 = tpu.dynamic_rotate %77 by %c64_i32_23 dim 1 : vector<8x128xf32>, i32 -> vector<8x128xf32>
    %79 = arith.maximumf %77, %78 : vector<8x128xf32>
    %c32_i32 = arith.constant 32 : i32
    %80 = tpu.dynamic_rotate %79 by %c32_i32 dim 1 : vector<8x128xf32>, i32 -> vector<8x128xf32>
    %81 = arith.maximumf %79, %80 : vector<8x128xf32>
    %c16_i32 = arith.constant 16 : i32
    %82 = tpu.dynamic_rotate %81 by %c16_i32 dim 1 : vector<8x128xf32>, i32 -> vector<8x128xf32>
    %83 = arith.maximumf %81, %82 : vector<8x128xf32>
    %c16_i32_24 = arith.constant 16 : i32
    %c0_i32 = arith.constant 0 : i32
    %84 = arith.cmpi eq, %c16_i32_24, %c0_i32 : i32
    %c1_i32 = arith.constant 1 : i32
    %85 = arith.select %84, %c1_i32, %c16_i32_24 : i32
    %86 = vector.broadcast %85 : i32 to vector<8x128xi32>
    %87 = arith.remsi %1, %86 : vector<8x128xi32>
    %c0_i32_25 = arith.constant 0 : i32
    %88 = vector.broadcast %c0_i32_25 : i32 to vector<8x128xi32>
    %89 = arith.cmpi ne, %87, %88 : vector<8x128xi32>
    %c0_i32_26 = arith.constant 0 : i32
    %90 = vector.broadcast %c0_i32_26 : i32 to vector<8x128xi32>
    %91 = arith.cmpi slt, %87, %90 : vector<8x128xi32>
    %c0_i32_27 = arith.constant 0 : i32
    %92 = arith.cmpi slt, %85, %c0_i32_27 : i32
    %93 = vector.broadcast %92 : i1 to vector<8x128xi1>
    %94 = vector.broadcast %93 : vector<8x128xi1> to vector<8x128xi1>
    %95 = arith.xori %91, %94 : vector<8x128xi1>
    %96 = arith.andi %95, %89 : vector<8x128xi1>
    %97 = vector.broadcast %85 : i32 to vector<8x128xi32>
    %98 = arith.addi %87, %97 : vector<8x128xi32>
    %99 = arith.select %96, %98, %87 : vector<8x128xi1>, vector<8x128xi32>
    %c12_i32 = arith.constant 12 : i32
    %100 = vector.broadcast %c12_i32 : i32 to vector<8x128xi32>
    %101 = arith.cmpi sge, %99, %100 : vector<8x128xi32>
    %102 = arith.select %101, %77, %83 : vector<8x128xi1>, vector<8x128xf32>
    %c0_28 = arith.constant 0 : index
    %c0_29 = arith.constant 0 : index
    %103 = vector.load %arg5[%c0_28, %c0_29] : memref<1x128xf32, #tpu.memory_space<vmem>>, vector<1x128xf32>
    %c0_30 = arith.constant 0 : index
    %c0_31 = arith.constant 0 : index
    %104 = vector.load %arg4[%c0_30, %c0_31] : memref<128x128xf32, #tpu.memory_space<vmem>>, vector<128x128xf32>
    %cst_32 = arith.constant dense<0.000000e+00> : vector<8x128xf32>
    %105 = tpu.matmul %102, %104, %cst_32 {dimension_numbers = #tpu.dot_dimension_numbers<[1], [0], [0], [1], [0, 0, 1, 1], [], []>} : vector<8x128xf32>, vector<128x128xf32>, vector<8x128xf32> -> vector<8x128xf32>
    %106 = vector.broadcast %103 : vector<1x128xf32> to vector<8x128xf32>
    %107 = arith.addf %106, %105 : vector<8x128xf32>
    %c0_33 = arith.constant 0 : index
    %c0_34 = arith.constant 0 : index
    %108 = vector.load %arg6[%c0_33, %c0_34] : memref<8x128xf32, #tpu.memory_space<vmem>>, vector<8x128xf32>
    tpu.vector_store %arg6[%c0_33, %c0_34], %107 {strides = array<i32>} : memref<8x128xf32, #tpu.memory_space<vmem>>, vector<8x128xf32>,
    return
  }
  func.func @transform_0(%arg0: i32) -> (i32, i32) {
    %c0_i32 = arith.constant 0 : i32
    %c0_i32_0 = arith.constant 0 : i32
    return %arg0, %c0_i32 : i32, i32
  }
  func.func @transform_1(%arg0: i32) -> (i32, i32, i32) {
    %c0_i32 = arith.constant 0 : i32
    %c0_i32_0 = arith.constant 0 : i32
    %c0_i32_1 = arith.constant 0 : i32
    %c0_i32_2 = arith.constant 0 : i32
    return %c0_i32, %c0_i32_0, %c0_i32_1 : i32, i32, i32
  }
  func.func @transform_2(%arg0: i32) -> (i32, i32) {
    %c0_i32 = arith.constant 0 : i32
    %c0_i32_0 = arith.constant 0 : i32
    %c0_i32_1 = arith.constant 0 : i32
    return %c0_i32, %c0_i32_0 : i32, i32
  }
  func.func @transform_3(%arg0: i32) -> (i32, i32) {
    %c0_i32 = arith.constant 0 : i32
    %c0_i32_0 = arith.constant 0 : i32
    %c0_i32_1 = arith.constant 0 : i32
    return %c0_i32, %c0_i32_0 : i32, i32
  }
  func.func @transform_4(%arg0: i32) -> (i32, i32) {
    %c0_i32 = arith.constant 0 : i32
    %c0_i32_0 = arith.constant 0 : i32
    %c0_i32_1 = arith.constant 0 : i32
    return %c0_i32, %c0_i32_0 : i32, i32
  }
  func.func @transform_5(%arg0: i32) -> (i32, i32) {
    %c0_i32 = arith.constant 0 : i32
    %c0_i32_0 = arith.constant 0 : i32
    return %arg0, %c0_i32 : i32, i32
  }
}

</mosaic_0001>

<bundles_post_ra>
// kernel: caser_forward.1
= control target key start
LH: loop header
LB: loop body
LE: loop exit
PB: predicated region body
PF: predicated region fallthrough
CT: control target
= control target key end

     0   :  { %10 = vsyncpa [#allocation3], 0  ;;  %s1097_s0 = inlined_call_operand.vmem [shape: s32[8,8], index: 0, kind: input, shape index: {}]   ;;  %s1098_s1 = inlined_call_operand.hbm [shape: f32[4,128,128], index: 1, kind: input, shape index: {}]   ;;  %s1099_s2 = inlined_call_operand.vmem [shape: f32[1,128], index: 2, kind: input, shape index: {}]   ;;  %s1100_s3 = inlined_call_operand.hbm [shape: f32[128,128], index: 3, kind: input, shape index: {}]   ;;  %s1101_s4 = inlined_call_operand.vmem [shape: f32[1,128], index: 4, kind: input, shape index: {}]   ;;  %s1102_s5 = inlined_call_operand.vmem [shape: f32[8,128], index: 5, kind: output, shape index: {}]  }
   0x1   :  { %11 = vsyncpa [#allocation5], 0  ;;  %s916_s18 = smov [#allocation2]  }
   0x2   :  { %s19_s19 = sshll.u32 %s916_s18, 4  ;;  %s20_s19 = int_to_ptr.vmem [resolvable:$true] %s19_s19 }
   0x3   :  { %s880_s20 = scalar_lea.vmem %s20_s19, 8192  ;;  %p885_p1 = scmp.lt.s32.totalorder %s20_s19, %s20_s19 }
   0x4   :  { %p881_p0 = scmp.ne.s32.totalorder %s20_s19, %s880_s20  ;;  %p886_p2 = scmp.lt.s32.totalorder %s880_s20, %s880_s20 }
   0x6   :  { %p887_p3 = por %p886_p2, %p885_p1 }
   0x8   :  { %p888_p4 = pnand %p887_p3, %p881_p0 }
   0xa   :  { %891 = shalt.err (!%p888_p4)
}
   0xb   :  { %s917_s21 = smov 128   ;;  %s918_s22 = smov 8  }
   0xc   :  { %25 = dma.hbm_to_vmem [thread:$0]  %s1098_s1, 8192, %s20_s19, [#allocation3], %s917_s21, %s917_s21, %s918_s22  }
   0xd   :  { %s919_s25 = smov [#allocation4]  }
   0xe   :  { %s33_s26 = sshll.u32 %s919_s25, 4  ;;  %s34_s26 = int_to_ptr.vmem [resolvable:$true] %s33_s26 }
   0xf   :  { %s900_s27 = scalar_lea.vmem %s34_s26, 2048  ;;  %p905_p6 = scmp.lt.s32.totalorder %s34_s26, %s34_s26 }
  0x10   :  { %p901_p5 = scmp.ne.s32.totalorder %s34_s26, %s900_s27  ;;  %p906_p7 = scmp.lt.s32.totalorder %s900_s27, %s900_s27 }
  0x12   :  { %p907_p8 = por %p906_p7, %p905_p6 }
  0x14   :  { %p908_p9 = pnand %p907_p8, %p901_p5 }
  0x16   :  { %911 = shalt.err (!%p908_p9)
}
  0x17   :  { %39 = dma.hbm_to_vmem [thread:$0]  %s1100_s3, 2048, %s34_s26, [#allocation5], %s917_s21, %s917_s21, %s918_s22  }
  0x18   :  { %912 = dma.done.wait [#allocation3], 8192  }
  0x19   :  { %913 = vsyncadd [#allocation3], 4294959104 }
  0x1a   :  { %914 = dma.done.wait [#allocation5], 2048  }
  0x1b   :  { %915 = vsyncadd [#allocation5], 4294965248  ;;  %v920_v0 = vmov 2   ;;  %v921_v1 = vmov 0   ;;  %v922_v2 = vmov 0.0   ;;  %v48_v3 = vld [vmem:[%s1097_s0] sm:$0xff]  ;;  %v49_v43 = vlaneseq }
  0x1c   :  { %863 = vset.pattern.permute.xlu0 %v920_v0  ;;  %865 = vset.pattern.permute.xlu1 %v921_v1  ;;  %v105_v4 = vld [vmem:[#allocation2 + $0xf8] sm:$0xff]  ;;  %v104_v6 = vld [vmem:[#allocation2 + $0xf0] sm:$0xff]  ;;  %v52_v8 = vadd.s32 64, %v48_v3  ;;  %v923_v9 = vmov 1   ;;  %v924_v10 = vmov 3   ;;  %v103_v11 = vld [vmem:[#allocation2 + $0xe8] sm:$0xff] }
  0x1d   :  { %670 = vmatprep.subr.mxu0 %v922_v2  ;;  %705 = vmatprep.subr.mxu1 %v922_v2  ;;  %v78_v5 = vld [vmem:[#allocation2 + $0x78] sm:$0xff]  ;;  %v77_v7 = vld [vmem:[#allocation2 + $0x70] sm:$0xff]  ;;  %v76_v12 = vld [vmem:[#allocation2 + $0x68] sm:$0xff]  ;;  %v925_v15 = vmov 4   ;;  %v926_v16 = vmov 5   ;;  %v927_v21 = vmov 6  }
  0x1e   :  { %54 = vperm.xlu1 %865, %v48_v3   ;;  %80 = vperm.xlu0 %863, %v48_v3   ;;  %v102_v13 = vld [vmem:[#allocation2 + $0xe0] sm:$0xff]  ;;  %v101_v17 = vld [vmem:[#allocation2 + $0xd8] sm:$0xff]  ;;  %v100_v19 = vld [vmem:[#allocation2 + $0xd0] sm:$0xff]  ;;  %v928_v26 = vmov 7   ;;  %vm929_vm0 = vmmov 0   ;;  %v1011_v44 = vand.u32 127, %v49_v43 }
  0x1f   :  { %671 = vmatpush3.msra.mxu0 %v105_v4  ;;  %706 = vmatpush3.msra.mxu1 %v78_v5  ;;  %v75_v14 = vld [vmem:[#allocation2 + $0x60] sm:$0xff]  ;;  %v74_v18 = vld [vmem:[#allocation2 + $0x58] sm:$0xff]  ;;  %v73_v20 = vld [vmem:[#allocation2 + $0x50] sm:$0xff]  ;;  %v930_v53 = vmov 1.0   ;;  %s931_s6 = smov 64   ;;  %s933_s7 = smov 16  }
  0x20   :  { %672 = vmatprep.subr.mxu0 %v922_v2  ;;  %707 = vmatprep.subr.mxu1 %v922_v2  ;;  %v99_v22 = vld [vmem:[#allocation2 + $0xc8] sm:$0xff]  ;;  %v98_v24 = vld [vmem:[#allocation2 + $0xc0] sm:$0xff]  ;;  %v97_v27 = vld [vmem:[#allocation2 + $0xb8] sm:$0xff]  ;;  %vm51_vm1 = vcmp.lt.s32.totalorder %v1011_v44, 64 }
  0x21   :  { %673 = vmatpush3.msra.mxu0 %v104_v6  ;;  %708 = vmatpush3.msra.mxu1 %v77_v7  ;;  %v72_v23 = vld [vmem:[#allocation2 + $0x48] sm:$0xff]  ;;  %v71_v25 = vld [vmem:[#allocation2 + $0x40] sm:$0xff]  ;;  %v70_v28 = vld [vmem:[#allocation2 + $0x38] sm:$0xff] }
  0x22   :  { %866 = vset.pattern.permute.xlu1 %v923_v9  ;;  %864 = vset.pattern.permute.xlu0 %v924_v10  ;;  %v96_v29 = vld [vmem:[#allocation2 + $0xb0] sm:$0xff]  ;;  %v95_v31 = vld [vmem:[#allocation2 + $0xa8] sm:$0xff]  ;;  %v94_v33 = vld [vmem:[#allocation2 + $0xa0] sm:$0xff] }
  0x23   :  { %57 = vperm.xlu1 %866, %v52_v8   ;;  %83 = vperm.xlu0 %864, %v52_v8   ;;  %v69_v30 = vld [vmem:[#allocation2 + $0x30] sm:$0xff]  ;;  %v68_v32 = vld [vmem:[#allocation2 + $0x28] sm:$0xff]  ;;  %v67_v34 = vld [vmem:[#allocation2 + $0x20] sm:$0xff] }
  0x24   :  { %674 = vmatprep.subr.mxu0 %v922_v2  ;;  %709 = vmatprep.subr.mxu1 %v922_v2  ;;  %v93_v35 = vld [vmem:[#allocation2 + $0x98] sm:$0xff]  ;;  %v92_v37 = vld [vmem:[#allocation2 + $0x90] sm:$0xff]  ;;  %v91_v39 = vld [vmem:[#allocation2 + $0x88] sm:$0xff] }
  0x25   :  { %675 = vmatpush3.msra.mxu0 %v103_v11  ;;  %710 = vmatpush3.msra.mxu1 %v76_v12  ;;  %v66_v36 = vld [vmem:[#allocation2 + $0x18] sm:$0xff]  ;;  %v65_v38 = vld [vmem:[#allocation2 + $0x10] sm:$0xff]  ;;  %v64_v40 = vld [vmem:[#allocation2 + $0x8] sm:$0xff] }
  0x26   :  { %676 = vmatprep.subr.mxu0 %v922_v2  ;;  %711 = vmatprep.subr.mxu1 %v922_v2  ;;  %v90_v41 = vld [vmem:[#allocation2 + $0x80] sm:$0xff]  ;;  %v272_v51 = vld [vmem:[#allocation2 + $0x178] sm:$0xff]  ;;  %v271_v54 = vld [vmem:[#allocation2 + $0x170] sm:$0xff] }
  0x27   :  { %867 = vset.pattern.permute.xlu1 %v925_v15  ;;  %868 = vset.pattern.permute.xlu0 %v926_v16  ;;  %v63_v42 = vld [vmem:[#allocation2] sm:$0xff]  ;;  %v370_v52 = vld [vmem:[#allocation2 + $0x1f8] sm:$0xff]  ;;  %v369_v55 = vld [vmem:[#allocation2 + $0x1f0] sm:$0xff] }
  0x28   :  { %247 = vperm.xlu1 %867, %v48_v3   ;;  %250 = vperm.xlu0 %868, %v52_v8   ;;  %v270_v56 = vld [vmem:[#allocation2 + $0x168] sm:$0xff]  ;;  %v269_v58 = vld [vmem:[#allocation2 + $0x160] sm:$0xff]  ;;  %v268_v60 = vld [vmem:[#allocation2 + $0x158] sm:$0xff] }
  0x29   :  { %677 = vmatpush3.msra.mxu0 %v102_v13  ;;  %712 = vmatpush3.msra.mxu1 %v75_v14  ;;  %v368_v57 = vld [vmem:[#allocation2 + $0x1e8] sm:$0xff]  ;;  %v367_v59 = vld [vmem:[#allocation2 + $0x1e0] sm:$0xff]  ;;  %v366_v61 = vld [vmem:[#allocation2 + $0x1d8] sm:$0xff] }
  0x2a   :  { %678 = vmatprep.subr.mxu0 %v922_v2  ;;  %713 = vmatprep.subr.mxu1 %v922_v2  ;;  %v267_v62 = vld [vmem:[#allocation2 + $0x150] sm:$0xff]  ;;  %v266_v0 = vld [vmem:[#allocation2 + $0x148] sm:$0xff]  ;;  %v363_v4 = vld [vmem:[#allocation2 + $0x1c0] sm:$0xff] }
  0x2b   :  { %679 = vmatpush3.msra.mxu0 %v101_v17  ;;  %714 = vmatpush3.msra.mxu1 %v74_v18  ;;  %v365_v63 = vld [vmem:[#allocation2 + $0x1d0] sm:$0xff]  ;;  %v364_v1 = vld [vmem:[#allocation2 + $0x1c8] sm:$0xff]  ;;  %v264_v5 = vld [vmem:[#allocation2 + $0x138] sm:$0xff] }
  0x2c   :  { %869 = vset.pattern.permute.xlu1 %v927_v21  ;;  %680 = vmatprep.subr.mxu0 %v922_v2  ;;  %v362_v6 = vld [vmem:[#allocation2 + $0x1b8] sm:$0xff]  ;;  %v361_v9 = vld [vmem:[#allocation2 + $0x1b0] sm:$0xff]  ;;  %v262_v10 = vld [vmem:[#allocation2 + $0x128] sm:$0xff] }
  0x2d   :  { %345 = vperm.xlu1 %869, %v48_v3   ;;  %715 = vmatprep.subr.mxu1 %v922_v2  ;;  %v265_v3 = vld [vmem:[#allocation2 + $0x140] sm:$0xff]  ;;  %v360_v11 = vld [vmem:[#allocation2 + $0x1a8] sm:$0xff]  ;;  %v260_v15 = vld [vmem:[#allocation2 + $0x118] sm:$0xff] }
  0x2e   :  { %681 = vmatpush3.msra.mxu0 %v100_v19  ;;  %716 = vmatpush3.msra.mxu1 %v73_v20  ;;  %v261_v13 = vld [vmem:[#allocation2 + $0x120] sm:$0xff]  ;;  %v358_v16 = vld [vmem:[#allocation2 + $0x198] sm:$0xff]  ;;  %v259_v17 = vld [vmem:[#allocation2 + $0x110] sm:$0xff] }
  0x2f   :  { %682 = vmatprep.subr.mxu0 %v922_v2  ;;  %717 = vmatprep.subr.mxu1 %v922_v2  ;;  %v359_v14 = vld [vmem:[#allocation2 + $0x1a0] sm:$0xff]  ;;  %v357_v18 = vld [vmem:[#allocation2 + $0x190] sm:$0xff]  ;;  %v258_v21 = vld [vmem:[#allocation2 + $0x108] sm:$0xff] }
  0x30   :  { %683 = vmatpush3.msra.mxu0 %v99_v22  ;;  %718 = vmatpush3.msra.mxu1 %v72_v23  ;;  %v356_v22 = vld [vmem:[#allocation2 + $0x188] sm:$0xff]  ;;  %v257_v23 = vld [vmem:[#allocation2 + $0x100] sm:$0xff] }
  0x31   :  { %870 = vset.pattern.permute.xlu1 %v928_v26  ;;  %684 = vmatprep.subr.mxu0 %v922_v2  ;;  %v488_v43 = vld [vmem:[#allocation4 + $0x68] sm:$0xff] }
  0x32   :  { %348 = vperm.xlu1 %870, %v52_v8   ;;  %719 = vmatprep.subr.mxu1 %v922_v2  ;;  %v263_v8 = vld [vmem:[#allocation2 + $0x130] sm:$0xff] }
  0x33   :  { %685 = vmatpush3.msra.mxu0 %v98_v24  ;;  %720 = vmatpush3.msra.mxu1 %v71_v25 }
  0x34   :  { %686 = vmatprep.subr.mxu0 %v922_v2  ;;  %721 = vmatprep.subr.mxu1 %v922_v2 }
  0x35   :  { %687 = vmatpush3.msra.mxu0 %v97_v27  ;;  %722 = vmatpush3.msra.mxu1 %v70_v28 }
  0x36   :  { %688 = vmatprep.subr.mxu0 %v922_v2  ;;  %723 = vmatprep.subr.mxu1 %v922_v2 }
  0x37   :  { %689 = vmatpush3.msra.mxu0 %v96_v29  ;;  %724 = vmatpush3.msra.mxu1 %v69_v30 }
  0x38   :  { %690 = vmatprep.subr.mxu0 %v922_v2  ;;  %725 = vmatprep.subr.mxu1 %v922_v2 }
  0x39   :  { %691 = vmatpush3.msra.mxu0 %v95_v31  ;;  %726 = vmatpush3.msra.mxu1 %v68_v32 }
  0x3a   :  { %692 = vmatprep.subr.mxu0 %v922_v2  ;;  %727 = vmatprep.subr.mxu1 %v922_v2 }
  0x3b   :  { %693 = vmatpush3.msra.mxu0 %v94_v33  ;;  %728 = vmatpush3.msra.mxu1 %v67_v34 }
  0x3c   :  { %694 = vmatprep.subr.mxu0 %v922_v2  ;;  %729 = vmatprep.subr.mxu1 %v922_v2 }
  0x3d   :  { %695 = vmatpush3.msra.mxu0 %v93_v35  ;;  %730 = vmatpush3.msra.mxu1 %v66_v36  ;;  %v583_v35 = vld [vmem:[%s1099_s2] ss:$0 sm:$0xff]  ;;  %s932_s2 = smov 32  }
  0x3e   :  { %696 = vmatprep.subr.mxu0 %v922_v2  ;;  %731 = vmatprep.subr.mxu1 %v922_v2 }
  0x3f   :  { %697 = vmatpush3.msra.mxu0 %v92_v37  ;;  %732 = vmatpush3.msra.mxu1 %v65_v38 }
  0x40   :  { %698 = vmatprep.subr.mxu0 %v922_v2  ;;  %733 = vmatprep.subr.mxu1 %v922_v2 }
  0x41   :  { %699 = vmatpush3.msra.mxu0 %v91_v39  ;;  %734 = vmatpush3.msra.mxu1 %v64_v40 }
  0x42   :  { %700 = vmatprep.subr.mxu0 %v922_v2  ;;  %735 = vmatprep.subr.mxu1 %v922_v2 }
  0x43   :  { %701 = vmatpush3.msra.mxu0 %v90_v41  ;;  %736 = vmatpush3.msra.mxu1 %v63_v42  ;;  %v490_v41 = vld [vmem:[#allocation4 + $0x78] sm:$0xff]  ;;  %v489_v42 = vld [vmem:[#allocation4 + $0x70] sm:$0xff] }
  0x44   :  { %702 = vmatprep.mubr.msk.f32.mxu0 %vm929_vm0, %v922_v2  ;;  %737 = vmatprep.mubr.msk.f32.mxu1 %vm929_vm0, %v922_v2 }
  0x45   :  { %740 = vmatprep.subr.mxu0 %v922_v2  ;;  %775 = vmatprep.subr.mxu1 %v922_v2 }
  0x46   :  { %871 = vset.pattern.permute.xlu0 %v928_v26  ;;  %v355_v26 = vld [vmem:[#allocation2 + $0x180] sm:$0xff] }
  0x99   :  { %v81_v45 = vpop.permute.xlu0 %80  ;;  %v55_v46 = vpop.permute.xlu1 %54 }
  0x9e   :  { %v58_v47 = vpop.permute.xlu1 %57  ;;  %v84_v48 = vpop.permute.xlu0 %83 }
  0x9f   :  { %v59_v49 = vsel %vm51_vm1, %v55_v46, %v58_v47  ;;  %v85_v50 = vsel %vm51_vm1, %v81_v45, %v84_v48  ;;  %v487_v45 = vld [vmem:[#allocation4 + $0x60] sm:$0xff]  ;;  %v486_v46 = vld [vmem:[#allocation4 + $0x58] sm:$0xff]  ;;  %v485_v48 = vld [vmem:[#allocation4 + $0x50] sm:$0xff] }
  0xa0   :  { %vm60_vm2 = vcmp.eq.s32.totalorder %v1011_v44, %v59_v49  ;;  %vm86_vm3 = vcmp.eq.s32.totalorder %v1011_v44, %v85_v50  ;;  %v484_v50 = vld [vmem:[#allocation4 + $0x48] sm:$0xff] }
  0xa1   :  { %703 = vmatmul.mubr.msk.f32.vlgmr.msra.gmra.mxu0 %vm86_vm3, %v930_v53  ;;  %738 = vmatmul.mubr.msk.f32.vlgmr.msra.gmra.mxu1 %vm60_vm2, %v930_v53 }
  0xa2   :  { %741 = vmatpush3.msra.mxu0 %v272_v51  ;;  %776 = vmatpush3.msra.mxu1 %v370_v52  ;;  %v483_v51 = vld [vmem:[#allocation4 + $0x40] sm:$0xff]  ;;  %v482_v52 = vld [vmem:[#allocation4 + $0x38] sm:$0xff] }
  0xa3   :  { %742 = vmatprep.subr.mxu0 %v922_v2  ;;  %777 = vmatprep.subr.mxu1 %v922_v2  ;;  %v248_v7 = vpop.permute.xlu1 %247  ;;  %v251_v19 = vpop.permute.xlu0 %250 }
  0xa4   :  { %743 = vmatpush3.msra.mxu0 %v271_v54  ;;  %778 = vmatpush3.msra.mxu1 %v369_v55  ;;  %v252_v24 = vsel %vm51_vm1, %v248_v7, %v251_v19  ;;  %v480_v54 = vld [vmem:[#allocation4 + $0x28] sm:$0xff]  ;;  %v479_v55 = vld [vmem:[#allocation4 + $0x20] sm:$0xff] }
  0xa5   :  { %744 = vmatprep.subr.mxu0 %v922_v2  ;;  %779 = vmatprep.subr.mxu1 %v922_v2  ;;  %vm253_vm4 = vcmp.eq.s32.totalorder %v1011_v44, %v252_v24 }
  0xa6   :  { %745 = vmatpush3.msra.mxu0 %v270_v56  ;;  %780 = vmatpush3.msra.mxu1 %v368_v57  ;;  %v478_v56 = vld [vmem:[#allocation4 + $0x18] sm:$0xff]  ;;  %v477_v57 = vld [vmem:[#allocation4 + $0x10] sm:$0xff] }
  0xa7   :  { %746 = vmatprep.subr.mxu0 %v922_v2  ;;  %781 = vmatprep.subr.mxu1 %v922_v2 }
  0xa8   :  { %747 = vmatpush3.msra.mxu0 %v269_v58  ;;  %782 = vmatpush3.msra.mxu1 %v367_v59  ;;  %v346_v12 = vpop.permute.xlu1 %345  ;;  %v476_v58 = vld [vmem:[#allocation4 + $0x8] sm:$0xff]  ;;  %v475_v59 = vld [vmem:[#allocation4] sm:$0xff] }
  0xa9   :  { %748 = vmatprep.subr.mxu0 %v922_v2  ;;  %783 = vmatprep.subr.mxu1 %v922_v2 }
  0xaa   :  { %749 = vmatpush3.msra.mxu0 %v268_v60  ;;  %784 = vmatpush3.msra.mxu1 %v366_v61 }
  0xab   :  { %750 = vmatprep.subr.mxu0 %v922_v2  ;;  %785 = vmatprep.subr.mxu1 %v922_v2 }
  0xac   :  { %751 = vmatpush3.msra.mxu0 %v267_v62  ;;  %786 = vmatpush3.msra.mxu1 %v365_v63  ;;  %v464_v62 = vand.u32 15, %v1011_v44 }
  0xad   :  { %752 = vmatprep.subr.mxu0 %v922_v2  ;;  %787 = vmatprep.subr.mxu1 %v922_v2  ;;  %v349_v20 = vpop.permute.xlu1 %348 }
  0xae   :  { %753 = vmatpush3.msra.mxu0 %v266_v0  ;;  %788 = vmatpush3.msra.mxu1 %v364_v1  ;;  %v350_v25 = vsel %vm51_vm1, %v346_v12, %v349_v20  ;;  %vm472_vm6 = vcmp.ge.s32.totalorder %v464_v62, 12 }
  0xaf   :  { %754 = vmatprep.subr.mxu0 %v922_v2  ;;  %789 = vmatprep.subr.mxu1 %v922_v2  ;;  %vm351_vm5 = vcmp.eq.s32.totalorder %v1011_v44, %v350_v25 }
  0xb0   :  { %755 = vmatpush3.msra.mxu0 %v265_v3  ;;  %790 = vmatpush3.msra.mxu1 %v363_v4  ;;  %v584_v3 = vld [vmem:[%s1101_s4] ss:$0 sm:$0xff] }
  0xb1   :  { %756 = vmatprep.subr.mxu0 %v922_v2  ;;  %791 = vmatprep.subr.mxu1 %v922_v2 }
  0xb2   :  { %757 = vmatpush3.msra.mxu0 %v264_v5  ;;  %792 = vmatpush3.msra.mxu1 %v362_v6 }
  0xb3   :  { %793 = vmatprep.subr.mxu1 %v922_v2  ;;  %758 = vmatprep.subr.mxu0 %v922_v2 }
  0xb4   :  { %759 = vmatpush3.msra.mxu0 %v263_v8  ;;  %794 = vmatpush3.msra.mxu1 %v361_v9 }
  0xb5   :  { %760 = vmatprep.subr.mxu0 %v922_v2  ;;  %795 = vmatprep.subr.mxu1 %v922_v2 }
  0xb6   :  { %761 = vmatpush3.msra.mxu0 %v262_v10  ;;  %796 = vmatpush3.msra.mxu1 %v360_v11 }
  0xb7   :  { %797 = vmatprep.subr.mxu1 %v922_v2  ;;  %762 = vmatprep.subr.mxu0 %v922_v2 }
  0xb8   :  { %763 = vmatpush3.msra.mxu0 %v261_v13  ;;  %798 = vmatpush3.msra.mxu1 %v359_v14 }
  0xb9   :  { %764 = vmatprep.subr.mxu0 %v922_v2  ;;  %799 = vmatprep.subr.mxu1 %v922_v2 }
  0xba   :  { %765 = vmatpush3.msra.mxu0 %v260_v15  ;;  %800 = vmatpush3.msra.mxu1 %v358_v16 }
  0xbb   :  { %801 = vmatprep.subr.mxu1 %v922_v2  ;;  %766 = vmatprep.subr.mxu0 %v922_v2 }
  0xbc   :  { %767 = vmatpush3.msra.mxu0 %v259_v17  ;;  %802 = vmatpush3.msra.mxu1 %v357_v18 }
  0xbd   :  { %768 = vmatprep.subr.mxu0 %v922_v2  ;;  %803 = vmatprep.subr.mxu1 %v922_v2 }
  0xbe   :  { %769 = vmatpush3.msra.mxu0 %v258_v21  ;;  %804 = vmatpush3.msra.mxu1 %v356_v22 }
  0xbf   :  { %770 = vmatprep.subr.mxu0 %v922_v2  ;;  %805 = vmatprep.subr.mxu1 %v922_v2 }
  0xc0   :  { %771 = vmatpush3.msra.mxu0 %v257_v23  ;;  %772 = vmatprep.mubr.msk.f32.mxu0 %vm929_vm0, %v922_v2 }
  0xc1   :  { %806 = vmatpush3.msra.mxu1 %v355_v26  ;;  %807 = vmatprep.mubr.msk.f32.mxu1 %vm929_vm0, %v922_v2 }
  0xc2   :  { %773 = vmatmul.mubr.msk.f32.vlgmr.msra.gmra.mxu0 %vm253_vm4, %v930_v53  ;;  %808 = vmatmul.mubr.msk.f32.vlgmr.msra.gmra.mxu1 %vm351_vm5, %v930_v53  ;;  %v481_v53 = vld [vmem:[#allocation4 + $0x30] sm:$0xff] }
  0xc3   :  { %810 = vmatprep.subr.mxu0 %v922_v2  ;;  %842 = vmatprep.mubr.msk.f32.mxu0 %vm929_vm0, %v922_v2 }
  0xc4   :  { %811 = vmatpush3.msra.mxu0 %v490_v41 }
  0xc5   :  { %812 = vmatprep.subr.mxu0 %v922_v2 }
  0xc6   :  { %813 = vmatpush3.msra.mxu0 %v489_v42 }
  0xc7   :  { %814 = vmatprep.subr.mxu0 %v922_v2 }
  0xc8   :  { %815 = vmatpush3.msra.mxu0 %v488_v43 }
  0xc9   :  { %816 = vmatprep.subr.mxu0 %v922_v2 }
  0xca   :  { %817 = vmatpush3.msra.mxu0 %v487_v45 }
  0xcb   :  { %818 = vmatprep.subr.mxu0 %v922_v2 }
  0xcc   :  { %819 = vmatpush3.msra.mxu0 %v486_v46 }
  0xcd   :  { %820 = vmatprep.subr.mxu0 %v922_v2 }
  0xce   :  { %821 = vmatpush3.msra.mxu0 %v485_v48 }
  0xcf   :  { %822 = vmatprep.subr.mxu0 %v922_v2 }
  0xd0   :  { %823 = vmatpush3.msra.mxu0 %v484_v50 }
  0xd1   :  { %824 = vmatprep.subr.mxu0 %v922_v2 }
  0xd2   :  { %825 = vmatpush3.msra.mxu0 %v483_v51 }
  0xd3   :  { %826 = vmatprep.subr.mxu0 %v922_v2 }
  0xd4   :  { %827 = vmatpush3.msra.mxu0 %v482_v52 }
  0xd5   :  { %828 = vmatprep.subr.mxu0 %v922_v2 }
  0xd6   :  { %829 = vmatpush3.msra.mxu0 %v481_v53 }
  0xd7   :  { %830 = vmatprep.subr.mxu0 %v922_v2 }
  0xd8   :  { %831 = vmatpush3.msra.mxu0 %v480_v54 }
  0xd9   :  { %832 = vmatprep.subr.mxu0 %v922_v2 }
  0xda   :  { %833 = vmatpush3.msra.mxu0 %v479_v55 }
  0xdb   :  { %834 = vmatprep.subr.mxu0 %v922_v2 }
  0xdc   :  { %835 = vmatpush3.msra.mxu0 %v478_v56 }
  0xdd   :  { %836 = vmatprep.subr.mxu0 %v922_v2 }
  0xde   :  { %837 = vmatpush3.msra.mxu0 %v477_v57 }
  0xdf   :  { %838 = vmatprep.subr.mxu0 %v922_v2 }
  0xe0   :  { %839 = vmatpush3.msra.mxu0 %v476_v58 }
  0xe1   :  { %840 = vmatprep.subr.mxu0 %v922_v2 }
  0xe2   :  { %841 = vmatpush3.msra.mxu0 %v475_v59 }
 0x161   :  { %v172_v27 = vpop.f32.mrf.mxu0  ;;  %v242_v28 = vpop.f32.mrf.mxu1 }
 0x162   :  { %v243_v31 = vadd.f32 %v242_v28, %v172_v27 }
 0x163   :  { %v704_v29 = vpop.f32.mrf.mxu0  ;;  %v739_v30 = vpop.f32.mrf.mxu1 }
 0x182   :  { %v339_v32 = vpop.f32.mrf.mxu0  ;;  %v437_v33 = vpop.f32.mrf.mxu1 }
 0x183   :  { %v343_v34 = vadd.f32 %v339_v32, %v243_v31 }
 0x184   :  { %v774_v36 = vpop.f32.mrf.mxu0  ;;  %v809_v37 = vpop.f32.mrf.mxu1 }
 0x185   :  { %v441_v38 = vadd.f32 %v437_v33, %v343_v34 }
 0x187   :  { %v449_v39 = vadd.f32 %v583_v35, %v441_v38 }
 0x189   :  { %v1070_v40 = vmax.f32 %v449_v39, 0.0 }
 0x18b   :  { %451 = vrot.lane.b32.xlu0 %v1070_v40, %s931_s6 }
 0x1fd   :  { %v452_v47 = vpop.permute.xlu0 %451 }
 0x1fe   :  { %v453_v49 = vmax.f32 %v1070_v40, %v452_v47 }
 0x200   :  { %454 = vrot.lane.b32.xlu1 %v453_v49, %s932_s2 }
 0x272   :  { %v455_v60 = vpop.permute.xlu1 %454 }
 0x273   :  { %v456_v61 = vmax.f32 %v453_v49, %v455_v60 }
 0x275   :  { %457 = vrot.lane.b32.xlu0 %v456_v61, %s933_s7 }
 0x2e7   :  { %v458_v63 = vpop.permute.xlu0 %457 }
 0x2e8   :  { %v459_v0 = vmax.f32 %v456_v61, %v458_v63 }
 0x2ea   :  { %v473_v1 = vsel %vm472_vm6, %v1070_v40, %v459_v0 }
 0x2eb   :  { %843 = vmatmul.mubr.f32.vlgmr.msra.gmra.mxu0 %v473_v1 }
 0x3ab   :  { %v557_v4 = vpop.f32.mrf.mxu0 }
 0x3ac   :  { %v567_v5 = vadd.f32 %v584_v3, %v557_v4 }
 0x3ad   :  { %v844_v2 = vpop.f32.mrf.mxu0 }
 0x3ae   :  { %568 = vst [vmem:[%s1102_s5] sm:$0xff] %v567_v5 }
 0x3af   :  { %573 = vsyncpa [#allocation3], 1 }
 0x3b0   :  { %574 = vsyncpa [#allocation5], 1 }

</bundles_post_ra>
